<compile_context>
chip_gen: v7x
topology: tpu7x:2x2x1
jax: 0.10.0
libtpu: 0.0.40
codegen_flags: <defaults>
</compile_context>

<pallas_src>
import jax
import jax.numpy as jnp
from jax.experimental import pallas as pl
from jax.experimental.pallas import tpu as pltpu


# ----------------------------- configuration --------------------------------
B = 2            # batch
IN_LEN = 8       # input sequence length
INPUT_SIZE = 4   # input feature size
HIDDEN = 32      # hidden size
PRE_LEN = 4      # prediction horizon
K = 3            # conv kernel size of TSCNCellOrigin (unused in synthetic cell)
AD = None        # default ("subtract last value") normalization branch
OUTPUT_SIZE = INPUT_SIZE
assert OUTPUT_SIZE == INPUT_SIZE, "`output + seq_last` requires output_size == input_size"

# integer ceil(log2(IN_LEN)) — equivalent to the module's float-log2 expression
LAYERS = (IN_LEN - 1).bit_length() if IN_LEN > 1 else 0
INPUT_LEN = 2 ** LAYERS
PAD = INPUT_LEN - IN_LEN
# Embedding is fused into cell 0; only valid when there are no zero-padded
# time steps (padded rows must see tanh(b_cell0), not tanh(b_emb @ Wc0 + bc0)).
# TODO(synk): add an unfused fallback path if a config with PAD > 0 is needed.
assert PAD == 0 and LAYERS >= 1

# ---- single packed-parameter slab layout (all offsets static Python ints) ---
#   rows [0, INPUT_SIZE)                 lanes [0,H) : W0' = W_emb @ W_cell0
#   row  B0_ROW                          lanes [0,H) : b0' = b_emb@Wc0 + bc0
#   rows [BC_ROW, BC_ROW+LAYERS-1)       lanes [0,H) : b_cells[1:]
#   rows [HDR_ROWS + j*H, +H) j=0..L-2   lanes [0,H) : W_cells[1:]
#   rows [WTB_OFF, +B*PRE_LEN)    lanes [0,B*T)      : block-diag kron(I_B, W_temp)
#   rows [WDIM_OFF, +HIDDEN)      lanes [0,O)        : W_dim
#   rows [BDEC_OFF, +B*PRE_LEN)   lanes [0,O)        : folded decode bias
B0_ROW = INPUT_SIZE
BC_ROW = INPUT_SIZE + 1
HDR_ROWS = -(-(INPUT_SIZE + 1 + (LAYERS - 1)) // 8) * 8   # round up to sublane multiple
WTB_OFF = HDR_ROWS + (LAYERS - 1) * HIDDEN
WDIM_OFF = WTB_OFF + B * PRE_LEN
BDEC_OFF = WDIM_OFF + HIDDEN
P_ROWS = BDEC_OFF + B * PRE_LEN
P_LANES = max(HIDDEN, B * INPUT_LEN, OUTPUT_SIZE)


# ------------------------------ Pallas kernel --------------------------------
def tscnd_kernel(x_ref, p_ref, out_ref):
    x = x_ref[...]                                          # (B*IN_LEN, I), 2-D

    # --- "else" Ad branch: subtract each batch's last observation ------------
    # Built strictly 2-D via per-batch sublane broadcasts; the same rows are
    # reused for the final un-normalization.
    last_rows = [x[(b + 1) * IN_LEN - 1:(b + 1) * IN_LEN, :] for b in range(B)]
    seq_in = jnp.concatenate(
        [jnp.broadcast_to(r, (IN_LEN, INPUT_SIZE)) for r in last_rows], axis=0)
    xc = x - seq_in                                         # (B*IN_LEN, I)

    # --- fused embedding + TSCN cell 0: h = tanh(xc @ W0' + b0') -------------
    h = jnp.tanh(
        jnp.dot(xc, p_ref[0:INPUT_SIZE, :], preferred_element_type=jnp.float32)
        + p_ref[B0_ROW:B0_ROW + 1, :])                      # (B*IN_LEN, H)

    # --- remaining TSCN cells (synthetic tanh cell, see module TODO) ---------
    for i in range(1, LAYERS):
        wc = p_ref[HDR_ROWS + (i - 1) * HIDDEN:HDR_ROWS + i * HIDDEN, :]
        bc = p_ref[BC_ROW + (i - 1):BC_ROW + i, :]
        h = jnp.tanh(jnp.dot(h, wc, preferred_element_type=jnp.float32) + bc)

    # --- fused decoding -------------------------------------------------------
    # TemporalDecoding over the merged batch axis as one block-diagonal matmul,
    # then DimDecoding; both biases pre-folded into b_dec (wrapper-side).
    w_tb = p_ref[WTB_OFF:WTB_OFF + B * PRE_LEN, 0:B * INPUT_LEN]         # (B*P, B*T)
    w_dim = p_ref[WDIM_OFF:WDIM_OFF + HIDDEN, 0:OUTPUT_SIZE]             # (H, O)
    b_dec = p_ref[BDEC_OFF:BDEC_OFF + B * PRE_LEN, 0:OUTPUT_SIZE]        # (B*P, O)

    t = jnp.dot(w_tb, h, preferred_element_type=jnp.float32)             # (B*P, H)
    o = jnp.dot(t, w_dim, preferred_element_type=jnp.float32) + b_dec    # (B*P, O)

    # --- undo normalization; single whole-block 2-D store ---------------------
    seq_out = jnp.concatenate(
        [jnp.broadcast_to(r, (PRE_LEN, OUTPUT_SIZE)) for r in last_rows], axis=0)
    out_ref[...] = o + seq_out


# --------------------- one-time parameter packing ----------------------------
def pack_params(w_emb, b_emb, w_cells, b_cells, w_dim, b_dim, w_temp, b_temp):
    """Run ONCE at parameter-load time (not on the per-call path)."""
    f32 = jnp.float32
    # Fuse embedding into cell 0 (valid since PAD == 0).
    w0 = w_emb @ w_cells[0]                                      # (I, H)
    b0 = b_emb @ w_cells[0] + b_cells[0]                         # (H,)
    # Block-diagonal temporal decode over the folded batch axis.
    w_tb = jnp.kron(jnp.eye(B, dtype=f32), w_temp)               # (B*P, B*T)
    # Fold DimDecoding + TemporalDecoding biases into one decode bias.
    b_dec = (w_temp.sum(axis=1, keepdims=True) * b_dim[None, :]
             + b_temp[:, None])                                  # (P, O)

    slab = jnp.zeros((P_ROWS, P_LANES), f32)
    slab = slab.at[0:INPUT_SIZE, 0:HIDDEN].set(w0)
    slab = slab.at[B0_ROW, 0:HIDDEN].set(b0)
    if LAYERS > 1:
        slab = slab.at[BC_ROW:BC_ROW + LAYERS - 1, 0:HIDDEN].set(b_cells[1:])
        slab = slab.at[HDR_ROWS:HDR_ROWS + (LAYERS - 1) * HIDDEN, 0:HIDDEN].set(
            w_cells[1:].reshape((LAYERS - 1) * HIDDEN, HIDDEN))
    slab = slab.at[WTB_OFF:WTB_OFF + B * PRE_LEN, 0:B * INPUT_LEN].set(w_tb)
    slab = slab.at[WDIM_OFF:WDIM_OFF + HIDDEN, 0:OUTPUT_SIZE].set(w_dim)
    slab = slab.at[BDEC_OFF:BDEC_OFF + B * PRE_LEN, 0:OUTPUT_SIZE].set(
        jnp.tile(b_dec, (B, 1)))
    return slab


# ------------------------------ per-call wrapper ------------------------------
@jax.jit
def tscnd_forward(x, pslab):
    """Per-call path: a free 2-D reshape of x + the gridless pallas_call."""
    out2d = pl.pallas_call(
        tscnd_kernel,
        out_shape=jax.ShapeDtypeStruct((B * PRE_LEN, OUTPUT_SIZE), jnp.float32),
        in_specs=[
            pl.BlockSpec(memory_space=pltpu.MemorySpace.VMEM),   # x, whole array
            pl.BlockSpec(memory_space=pltpu.MemorySpace.VMEM),   # packed param slab
        ],
        out_specs=pl.BlockSpec(memory_space=pltpu.MemorySpace.VMEM),
    )(x.reshape(B * IN_LEN, INPUT_SIZE), pslab)
    return out2d.reshape(B, PRE_LEN, OUTPUT_SIZE)


# ------------------------- pure-JAX reference --------------------------------
def tscnd_reference(x, w_emb, b_emb, w_cells, b_cells, w_dim, b_dim, w_temp, b_temp):
    seq_last = x[:, -1:, :]
    xc = x - seq_last
    h = xc @ w_emb + b_emb[None]                                   # (B, IN_LEN, H)
    if PAD > 0:
        h = jnp.concatenate(
            [jnp.zeros((B, PAD, HIDDEN), h.dtype), h], axis=1)
    for i in range(LAYERS):
        h = jnp.tanh(h @ w_cells[i] + b_cells[i])
    o1 = h @ w_dim + b_dim[None]                                   # (B, INPUT_LEN, O)
    o2 = jnp.einsum('pt,bto->bpo', w_temp, o1) + b_temp[None, :, None]
    return o2 + seq_last


# ------------------------------ main ------------------------------------------
if __name__ == "__main__":
    key = jax.random.PRNGKey(0)
    keys = jax.random.split(key, 10)

    x = jax.random.normal(keys[0], (B, IN_LEN, INPUT_SIZE), jnp.float32)

    # Deterministic synthetic parameters (shapes follow the module's __init__).
    w_emb = 0.1 * jax.random.normal(keys[1], (INPUT_SIZE, HIDDEN), jnp.float32)
    b_emb = 0.1 * jax.random.normal(keys[2], (HIDDEN,), jnp.float32)
    w_cells = 0.1 * jax.random.normal(keys[3], (LAYERS, HIDDEN, HIDDEN), jnp.float32)
    b_cells = 0.1 * jax.random.normal(keys[4], (LAYERS, HIDDEN), jnp.float32)
    w_dim = 0.1 * jax.random.normal(keys[5], (HIDDEN, OUTPUT_SIZE), jnp.float32)
    b_dim = 0.1 * jax.random.normal(keys[6], (OUTPUT_SIZE,), jnp.float32)
    w_temp = 0.1 * jax.random.normal(keys[7], (PRE_LEN, INPUT_LEN), jnp.float32)
    b_temp = 0.1 * jax.random.normal(keys[8], (PRE_LEN,), jnp.float32)

    # Parameter packing happens ONCE, outside the per-call jit path.
    pslab = jax.block_until_ready(
        pack_params(w_emb, b_emb, w_cells, b_cells, w_dim, b_dim, w_temp, b_temp))

    out = tscnd_forward(x, pslab)
    out = jax.block_until_ready(out)

    # Correctness check against a pure-JAX reference of the same semantics.
    ref = tscnd_reference(x, w_emb, b_emb, w_cells, b_cells,
                          w_dim, b_dim, w_temp, b_temp)
    assert out.shape == (B, PRE_LEN, OUTPUT_SIZE)
    assert jnp.allclose(out, ref, atol=1e-4, rtol=1e-4), "mismatch vs reference"

    print("KERNEL_OK")
</pallas_src>

<mosaic_0001>
module attributes {stable_mosaic.version = 11 : i64} {
  func.func @tscnd_kernel(%arg0: memref<16x4xf32, #tpu.memory_space<vmem>>, %arg1: memref<120x32xf32, #tpu.memory_space<vmem>>, %arg2: memref<8x4xf32, #tpu.memory_space<vmem>>) attributes {dimension_semantics = [], scalar_prefetch = 0 : i64, scratch_operands = 0 : i64, tpu.core_type = #tpu.core_type<tc>} {
    %c0 = arith.constant 0 : index
    %c0_0 = arith.constant 0 : index
    %0 = vector.load %arg0[%c0, %c0_0] : memref<16x4xf32, #tpu.memory_space<vmem>>, vector<16x4xf32>
    %1 = vector.extract_strided_slice %0 {offsets = [7, 0], sizes = [1, 4], strides = [1, 1]} : vector<16x4xf32> to vector<1x4xf32>
    %2 = vector.extract_strided_slice %0 {offsets = [15, 0], sizes = [1, 4], strides = [1, 1]} : vector<16x4xf32> to vector<1x4xf32>
    %3 = vector.shape_cast %1 : vector<1x4xf32> to vector<1x4xf32>
    %4 = vector.broadcast %3 : vector<1x4xf32> to vector<8x4xf32>
    %5 = vector.shape_cast %2 : vector<1x4xf32> to vector<1x4xf32>
    %6 = vector.broadcast %5 : vector<1x4xf32> to vector<8x4xf32>
    %7 = tpu.concatenate %4, %6 in 0 : vector<8x4xf32>, vector<8x4xf32> -> vector<16x4xf32>
    %8 = arith.subf %0, %7 : vector<16x4xf32>
    %c0_1 = arith.constant 0 : index
    %c0_2 = arith.constant 0 : index
    %9 = vector.load %arg1[%c0_1, %c0_2] : memref<120x32xf32, #tpu.memory_space<vmem>>, vector<4x32xf32>
    %cst = arith.constant dense<0.000000e+00> : vector<16x32xf32>
    %10 = tpu.matmul %8, %9, %cst {dimension_numbers = #tpu.dot_dimension_numbers<[1], [0], [0], [1], [0, 0, 1, 1], [], []>} : vector<16x4xf32>, vector<4x32xf32>, vector<16x32xf32> -> vector<16x32xf32>
    %c4 = arith.constant 4 : index
    %c0_3 = arith.constant 0 : index
    %11 = vector.load %arg1[%c4, %c0_3] : memref<120x32xf32, #tpu.memory_space<vmem>>, vector<1x32xf32>
    %12 = vector.broadcast %11 : vector<1x32xf32> to vector<16x32xf32>
    %13 = arith.addf %10, %12 : vector<16x32xf32>
    %14 = math.tanh %13 : vector<16x32xf32>
    %c8 = arith.constant 8 : index
    %c0_4 = arith.constant 0 : index
    %15 = vector.load %arg1[%c8, %c0_4] : memref<120x32xf32, #tpu.memory_space<vmem>>, vector<32x32xf32>
    %c5 = arith.constant 5 : index
    %c0_5 = arith.constant 0 : index
    %16 = vector.load %arg1[%c5, %c0_5] : memref<120x32xf32, #tpu.memory_space<vmem>>, vector<1x32xf32>
    %cst_6 = arith.constant dense<0.000000e+00> : vector<16x32xf32>
    %17 = tpu.matmul %14, %15, %cst_6 {dimension_numbers = #tpu.dot_dimension_numbers<[1], [0], [0], [1], [0, 0, 1, 1], [], []>} : vector<16x32xf32>, vector<32x32xf32>, vector<16x32xf32> -> vector<16x32xf32>
    %18 = vector.broadcast %16 : vector<1x32xf32> to vector<16x32xf32>
    %19 = arith.addf %17, %18 : vector<16x32xf32>
    %20 = math.tanh %19 : vector<16x32xf32>
    %c40 = arith.constant 40 : index
    %c0_7 = arith.constant 0 : index
    %21 = vector.load %arg1[%c40, %c0_7] : memref<120x32xf32, #tpu.memory_space<vmem>>, vector<32x32xf32>
    %c6 = arith.constant 6 : index
    %c0_8 = arith.constant 0 : index
    %22 = vector.load %arg1[%c6, %c0_8] : memref<120x32xf32, #tpu.memory_space<vmem>>, vector<1x32xf32>
    %cst_9 = arith.constant dense<0.000000e+00> : vector<16x32xf32>
    %23 = tpu.matmul %20, %21, %cst_9 {dimension_numbers = #tpu.dot_dimension_numbers<[1], [0], [0], [1], [0, 0, 1, 1], [], []>} : vector<16x32xf32>, vector<32x32xf32>, vector<16x32xf32> -> vector<16x32xf32>
    %24 = vector.broadcast %22 : vector<1x32xf32> to vector<16x32xf32>
    %25 = arith.addf %23, %24 : vector<16x32xf32>
    %26 = math.tanh %25 : vector<16x32xf32>
    %c72 = arith.constant 72 : index
    %c0_10 = arith.constant 0 : index
    %27 = vector.load %arg1[%c72, %c0_10] : memref<120x32xf32, #tpu.memory_space<vmem>>, vector<8x16xf32>
    %c80 = arith.constant 80 : index
    %c0_11 = arith.constant 0 : index
    %28 = vector.load %arg1[%c80, %c0_11] : memref<120x32xf32, #tpu.memory_space<vmem>>, vector<32x4xf32>
    %c112 = arith.constant 112 : index
    %c0_12 = arith.constant 0 : index
    %29 = vector.load %arg1[%c112, %c0_12] : memref<120x32xf32, #tpu.memory_space<vmem>>, vector<8x4xf32>
    %cst_13 = arith.constant dense<0.000000e+00> : vector<8x32xf32>
    %30 = tpu.matmul %27, %26, %cst_13 {dimension_numbers = #tpu.dot_dimension_numbers<[1], [0], [0], [1], [0, 0, 1, 1], [], []>} : vector<8x16xf32>, vector<16x32xf32>, vector<8x32xf32> -> vector<8x32xf32>
    %cst_14 = arith.constant dense<0.000000e+00> : vector<8x4xf32>
    %31 = tpu.matmul %30, %28, %cst_14 {dimension_numbers = #tpu.dot_dimension_numbers<[1], [0], [0], [1], [0, 0, 1, 1], [], []>} : vector<8x32xf32>, vector<32x4xf32>, vector<8x4xf32> -> vector<8x4xf32>
    %32 = arith.addf %31, %29 : vector<8x4xf32>
    %33 = vector.shape_cast %1 : vector<1x4xf32> to vector<1x4xf32>
    %34 = vector.broadcast %33 : vector<1x4xf32> to vector<4x4xf32>
    %35 = vector.shape_cast %2 : vector<1x4xf32> to vector<1x4xf32>
    %36 = vector.broadcast %35 : vector<1x4xf32> to vector<4x4xf32>
    %37 = tpu.concatenate %34, %36 in 0 : vector<4x4xf32>, vector<4x4xf32> -> vector<8x4xf32>
    %38 = arith.addf %32, %37 : vector<8x4xf32>
    %c0_15 = arith.constant 0 : index
    %c0_16 = arith.constant 0 : index
    %39 = vector.load %arg2[%c0_15, %c0_16] : memref<8x4xf32, #tpu.memory_space<vmem>>, vector<8x4xf32>
    tpu.vector_store %arg2[%c0_15, %c0_16], %38 {strides = array<i32>} : memref<8x4xf32, #tpu.memory_space<vmem>>, vector<8x4xf32>,
    return
  }
}

</mosaic_0001>

<bundles_post_ra>
// kernel: tscnd_forward.1
= control target key start
LH: loop header
LB: loop body
LE: loop exit
PB: predicated region body
PF: predicated region fallthrough
CT: control target
= control target key end

     0   :  { %vm37_vm0 = vcmask 1043456   ;;  %v14_v1 = vlaneseq  ;;  %s728_s0 = inlined_call_operand.vmem [shape: f32[16,4], index: 0, kind: input, shape index: {}]   ;;  %s729_s1 = inlined_call_operand.vmem [shape: f32[120,32], index: 1, kind: input, shape index: {}]   ;;  %s730_s2 = inlined_call_operand.hbm [shape: f32[8,4], index: 2, kind: output, shape index: {}]  }
   0x1   :  { %v24_v0 = vld [vmem:[%s729_s1] sm:$0xf] }
   0x2   :  { %508 = vmatprep.subr.msk.mxu1 %vm37_vm0, %v24_v0 }
   0x3   :  { %7 = vsyncpa [#allocation3], 0  ;;  %509 = vmatpush3.msk.msra.mxu1 %vm37_vm0, %v24_v0  ;;  %v15_v2 = vshrl.u32 %v14_v1, 7  ;;  %v12_v3 = vld [vmem:[%s728_s0] sm:$0xff]  ;;  %v13_v4 = vld [vmem:[%s728_s0 + $0x8] sm:$0xff]  ;;  %vm30_vm1 = vcmask 31744  }
   0x4   :  { %v118_v10 = vld [vmem:[%s729_s1 + $0x8] sm:$0xff]  ;;  %v119_v11 = vld [vmem:[%s729_s1 + $0x10] sm:$0xff]  ;;  %v120_v12 = vld [vmem:[%s729_s1 + $0x18] sm:$0xff]  ;;  %vm127_vm2 = vcmask 261120   ;;  %v618_v36 = vmov 0.0|0.0   ;;  %vm619_vm3 = vmmov 0  }
   0x5   :  { %v16_v5 = vsub.s32 7, %v15_v2  ;;  %v553_v13 = vpack.c.bf16 %v119_v11, %v118_v10  ;;  %v121_v14 = vld [vmem:[%s729_s1 + $0x20] sm:$0xff]  ;;  %v211_v23 = vld [vmem:[%s729_s1 + $0x28] sm:$0xff]  ;;  %v212_v24 = vld [vmem:[%s729_s1 + $0x30] sm:$0xff]  ;;  %v620_v37 = vmov 0.0   ;;  %vm309_vm4 = vcmask 130048  }
   0x6   :  { %v557_v15 = vpack.c.bf16 %v121_v14, %v120_v12  ;;  %v473_v16 = vld [vmem:[%s729_s1 + $0x4] ss:$0 sm:$0xff]  ;;  %v213_v25 = vld [vmem:[%s729_s1 + $0x38] sm:$0xff]  ;;  %v561_v26 = vpack.c.bf16 %v212_v24, %v211_v23  ;;  %v477_v29 = vld [vmem:[%s729_s1 + $0x5] ss:$0 sm:$0xff]  ;;  %s621_s19 = smov [#allocation2]  }
   0x7   :  { %v648_v6 = vrot.slane %v12_v3, %v16_v5  ;;  %v650_v7 = vrot.slane %v13_v4, %v16_v5  ;;  %554 = vmatprep.subr.bf16.mxu1 %v553_v13  ;;  %v214_v27 = vld [vmem:[%s729_s1 + $0x40] sm:$0xff]  ;;  %v304_v38 = vld [vmem:[%s729_s1 + $0x50] sm:$0xff]  ;;  %v305_v39 = vld [vmem:[%s729_s1 + $0x58] sm:$0xff]  ;;  %s465_s20 = sshll.u32 %s621_s19, 4  ;;  %s466_s20 = int_to_ptr.vmem [resolvable:$true] %s465_s20 }
   0x8   :  { %v565_v28 = vpack.c.bf16 %v214_v27, %v213_v25  ;;  %562 = vmatprep.subr.bf16.mxu0 %v561_v26  ;;  %v306_v40 = vld [vmem:[%s729_s1 + $0x60] sm:$0xff]  ;;  %v573_v41 = vpack.c.bf16 %v305_v39, %v304_v38  ;;  %v307_v42 = vld [vmem:[%s729_s1 + $0x68] sm:$0xff]  ;;  %v308_v55 = vld [vmem:[%s729_s1 + $0x70] sm:$0xff]  ;;  %s594_s21 = scalar_lea.vmem %s466_s20, 128  ;;  %p599_p1 = scmp.lt.s32.totalorder %s466_s20, %s466_s20 }
   0x9   :  { %v22_v8 = vsub.f32 %v12_v3, %v648_v6  ;;  %v23_v9 = vsub.f32 %v13_v4, %v650_v7  ;;  %564 = vmatpush3.bf16.msra.mxu0 %v561_v26  ;;  %v576_v43 = vpack.c.bf16 %v307_v42, %v306_v40  ;;  %v480_v44 = vld [vmem:[%s729_s1 + $0x6] ss:$0 sm:$0xff]  ;;  %v303_v52 = vld [vmem:[%s729_s1 + $0x48] sm:$0xff]  ;;  %v456_v57 = vsel %vm37_vm0, %v648_v6, %v650_v7  ;;  %p595_p0 = scmp.ne.s32.totalorder %s466_s20, %s594_s21  ;;  %p600_p2 = scmp.lt.s32.totalorder %s594_s21, %s594_s21 }
   0xa   :  { %566 = vmatprep.subr.bf16.mxu0 %v565_v28 }
   0xb   :  { %510 = vmatprep.mubr.msk.f32.mxu1 %vm30_vm1, %v22_v8  ;;  %p601_p3 = por %p600_p2, %p599_p1 }
   0xc   :  { %511 = vmatmul.mubr.msk.f32.vlgmr.msra.gmra.mrb[0].mxu1 %vm30_vm1, %v23_v9 }
   0xd   :  { %556 = vmatpush3.bf16.msra.mxu1 %v553_v13  ;;  %568 = vmatpush3.bf16.msra.mxu0 %v565_v28  ;;  %p602_p4 = pnand %p601_p3, %p595_p0 }
   0xe   :  { %558 = vmatprep.subr.bf16.mxu1 %v557_v15  ;;  %572 = vmatprep.subr.bf16.mxu0 %v618_v36 }
  0x11   :  { %560 = vmatpush3.bf16.msra.mxu1 %v557_v15 }
  0x12   :  { %569 = vmatprep.subr.bf16.mxu1 %v618_v36 }
  0xdf   :  { %v512_v17 = vpop.f32.mrb[0].mxu1 }
  0xe0   :  { %v113_v18 = vadd.f32 %v512_v17, %v473_v16  ;;  %v107_v19 = vpop.f32.mrb[1].mxu1 }
  0xe1   :  { %v108_v20 = vadd.f32 %v473_v16, %v107_v19 }
  0xe3   :  { %582 = vtanh.f32 %v108_v20 }
  0xe4   :  { %584 = vtanh.f32 %v113_v18 }
  0xed   :  { %v583_v21 = vpop.eup %582 }
  0xee   :  { %v585_v22 = vpop.eup %584  ;;  %521 = vmatprep.mubr.msk.f32.mxu1 %vm127_vm2, %v583_v21 }
  0xef   :  { %522 = vmatmul.mubr.msk.f32.vlgmr.msra.gmra.mrb[2].mxu1 %vm127_vm2, %v585_v22 }
  0xf0   :  { %539 = vmatprep.mubr.msk.f32.mxu1 %vm619_vm3, %v620_v37 }
 0x1c2   :  { %v523_v30 = vpop.f32.mrb[2].mxu1 }
 0x1c3   :  { %v206_v31 = vadd.f32 %v523_v30, %v477_v29  ;;  %v200_v32 = vpop.f32.mrb[3].mxu1 }
 0x1c4   :  { %v201_v33 = vadd.f32 %v477_v29, %v200_v32 }
 0x1c6   :  { %586 = vtanh.f32 %v201_v33 }
 0x1c7   :  { %588 = vtanh.f32 %v206_v31 }
 0x1d0   :  { %v587_v34 = vpop.eup %586 }
 0x1d1   :  { %v589_v35 = vpop.eup %588  ;;  %532 = vmatprep.mubr.msk.f32.mxu0 %vm127_vm2, %v587_v34 }
 0x1d2   :  { %533 = vmatmul.mubr.msk.f32.vlgmr.msra.gmra.mrb[0].mxu0 %vm127_vm2, %v589_v35 }
 0x1d3   :  { %550 = vmatprep.mubr.msk.f32.mxu0 %vm619_vm3, %v620_v37  ;;  %574 = vmatpush3.bf16.msra.mxu0 %v573_v41 }
 0x1d4   :  { %575 = vmatprep.subr.bf16.mxu0 %v618_v36 }
 0x1d7   :  { %577 = vmatpush3.bf16.msra.mxu0 %v576_v43 }
 0x2a5   :  { %v534_v45 = vpop.f32.mrb[0].mxu0 }
 0x2a6   :  { %v298_v46 = vadd.f32 %v534_v45, %v480_v44  ;;  %v292_v47 = vpop.f32.mrb[1].mxu0 }
 0x2a7   :  { %v293_v48 = vadd.f32 %v480_v44, %v292_v47 }
 0x2a8   :  { %590 = vtanh.f32 %v298_v46 }
 0x2a9   :  { %592 = vtanh.f32 %v293_v48 }
 0x2b2   :  { %v591_v49 = vpop.eup %590 }
 0x2b3   :  { %v593_v50 = vpop.eup %592 }
 0x2b4   :  { %v570_v51 = vpack.c.bf16 %v591_v49, %v593_v50 }
 0x2b6   :  { %571 = vmatpush3.bf16.msra.mxu1 %v570_v51 }
 0x2b9   :  { %540 = vmatmul.mubr.msk.f32.vlgmr.msra.gmra.mrb[4].mxu1 %vm309_vm4, %v303_v52 }
 0x38c   :  { %v379_v53 = vpop.f32.mrb[4].mxu1 }
 0x38d   :  { %v541_v54 = vpop.f32.mrb[5].mxu1  ;;  %551 = vmatmul.mubr.msk.f32.vlgmr.msra.gmra.mrb[2].mxu0 %vm127_vm2, %v379_v53 }
 0x460   :  { %v452_v56 = vpop.f32.mrb[2].mxu0 }
 0x461   :  { %v453_v58 = vadd.f32 %v452_v56, %v308_v55  ;;  %v552_v59 = vpop.f32.mrb[3].mxu0 }
 0x463   :  { %v457_v60 = vadd.f32 %v456_v57, %v453_v58 }
 0x465   :  { %458 = vst.msk [vmem:[#allocation2] sm:$0xff] %vm30_vm1, %v457_v60 }
 0x466   :  { %605 = shalt.err (!%p602_p4)
}
 0x467   :  { %s606_s23 = scalar_lea.hbm %s730_s2, 128 }
 0x468   :  { %p607_p5 = scmp.ne.s32.totalorder %s730_s2, %s606_s23  ;;  %p610_p6 = scmp.lt.u32.totalorder %s606_s23, %s730_s2 }
 0x46a   :  { %p612_p7 = pnand %p610_p6, %p607_p5 }
 0x46c   :  { %615 = shalt.err (!%p612_p7)
}
 0x46d   :  { %468 = dma.vmem_to_hbm [thread:$0]  %s466_s20, 128, %s730_s2, [#allocation3]  }
 0x46e   :  { %616 = dma.done.wait [#allocation3], 128  }
 0x46f   :  { %617 = vsyncadd [#allocation3], 4294967168 }
 0x470   :  { %472 = vsyncpa [#allocation3], 1 }

</bundles_post_ra>
